<compile_context>
chip_gen: v7x
topology: tpu7x:2x2x1
jax: 0.10.0
libtpu: 0.0.40
codegen_flags: <defaults>
</compile_context>

<pallas_src>
import math

import jax
import jax.numpy as jnp
from jax.experimental import pallas as pl
from jax.experimental.pallas import tpu as pltpu


# ----------------------------- kernels -----------------------------

def _fused_kernel(x_ref, w_ref, b_ref, out_ref):
    """Single-pass path (whole vocab resident): projection + log_softmax in one step."""
    logits = jnp.dot(x_ref[...], w_ref[...], preferred_element_type=jnp.float32)
    logits = logits + b_ref[...].astype(jnp.float32)
    m = jnp.max(logits, axis=-1, keepdims=True)
    shifted = logits - m
    lse = jnp.log(jnp.sum(jnp.exp(shifted), axis=-1, keepdims=True))
    out_ref[...] = (shifted - lse).astype(out_ref.dtype)


def _tiled_kernel(x_ref, w_ref, b_ref, out_ref, m_ref, l_ref):
    """Vocab-tiled two-pass path.

    grid = (row_tiles, 2, vocab_tiles).  Phase 0: online (max, sum-exp) over vocab tiles.
    Phase 1: recompute the tile's logits and write normalized log-probs (lane-dense).
    The output block index is held at (i, 0) through phase 0, so no junk is ever written
    back to HBM — only the phase-1 stores reach memory.
    """
    phase = pl.program_id(1)
    kv = pl.program_id(2)

    @pl.when(jnp.logical_and(phase == 0, kv == 0))
    def _():
        m_ref[...] = jnp.full_like(m_ref, -jnp.inf)
        l_ref[...] = jnp.zeros_like(l_ref)

    # MXU matmul with f32 accumulation; operands keep their dtype (bf16 is MXU-native).
    logits = jnp.dot(x_ref[...], w_ref[...], preferred_element_type=jnp.float32)
    logits = logits + b_ref[...].astype(jnp.float32)

    @pl.when(phase == 0)
    def _():
        m_prev = m_ref[...]
        m_new = jnp.maximum(m_prev, jnp.max(logits, axis=-1, keepdims=True))
        corr = jnp.exp(m_prev - m_new)
        l_ref[...] = l_ref[...] * corr + jnp.sum(jnp.exp(logits - m_new),
                                                 axis=-1, keepdims=True)
        m_ref[...] = m_new

    @pl.when(phase == 1)
    def _():
        lse = m_ref[...] + jnp.log(l_ref[...])
        out_ref[...] = (logits - lse).astype(out_ref.dtype)


# ----------------------------- tiling helpers -----------------------------

def _round_up(x, m):
    return (x + m - 1) // m * m


def _vmem_capacity_bytes():
    try:
        return int(pltpu.get_tpu_info().vmem_capacity_bytes)
    except Exception:
        return 64 * 1024 * 1024  # conservative: v7x per-TensorCore VMEM


def _pick_block_rows(m_rows, cap):
    """Largest power-of-two row tile <= cap with bounded zero-padding overhead."""
    best, cand = 8, 8
    while cand <= cap:
        if _round_up(m_rows, cand) - m_rows <= max(m_rows // 8, 7):
            best = cand
        cand *= 2
    return best


def _pick_block_cols(vocab, cap=2048):
    """Largest lane-dense (multiple of 128) divisor of vocab, capped at `cap`."""
    if vocab % 128 != 0:
        # TODO(synk): pad ragged vocab to a multiple of 128 with a -inf logit mask instead
        # of falling back to a single (possibly masked-store) full-vocab tile.
        return vocab
    best = 128
    for cand in range(128, min(cap, vocab) + 1, 128):
        if vocab % cand == 0:
            best = cand
    return best


# ----------------------------- wrapper -----------------------------

def generator(x, w, b, *, out_dtype=None, block_rows=None, block_cols=None,
              interpret=False):
    """log_softmax(x @ w + b, axis=-1).

    x: (..., d_model); w: (d_model, vocab) (torch nn.Linear weight pre-transposed so the
    vocab lands on the 128-lane axis); b: (vocab,).  out_dtype defaults to x.dtype
    (matching F.log_softmax); pass jnp.float32 explicitly if a downstream loss needs
    full-precision log-probs.
    """
    *lead, d_model = x.shape
    assert w.shape[0] == d_model
    vocab = w.shape[1]
    out_dtype = jnp.dtype(out_dtype or x.dtype)

    m_rows = int(math.prod(lead)) if lead else 1
    x2 = x.reshape(m_rows, d_model)
    b2 = b.reshape(1, vocab)

    # ---- generation-aware tiling & VMEM budget ----------------------------------
    vmem_cap = _vmem_capacity_bytes()
    budget = int(0.85 * vmem_cap)                              # headroom below physical VMEM
    row_cap = 256 if vmem_cap <= 80 * 1024 * 1024 else 512     # v7x (64 MiB/TC) vs v5e/v6e

    tm = block_rows or _pick_block_rows(m_rows, row_cap)
    tn = block_cols or _pick_block_cols(vocab)

    def est_bytes(tm_, tn_):
        # double-buffered x/w/b/out tiles + live f32 logits temporaries + row-stat scratch
        x_b = 2 * tm_ * d_model * x.dtype.itemsize
        w_b = 2 * d_model * tn_ * w.dtype.itemsize
        b_b = 2 * 8 * max(tn_, 128) * b.dtype.itemsize
        o_b = 2 * tm_ * tn_ * out_dtype.itemsize
        tmp = 2 * tm_ * tn_ * 4
        st = 2 * tm_ * 128 * 4
        return x_b + w_b + b_b + o_b + tmp + st

    while est_bytes(tm, tn) > budget:
        if tn > 128 and vocab % 128 == 0:
            new_tn = _pick_block_cols(vocab, cap=max(tn // 2, 128))
            if new_tn < tn:
                tn = new_tn
                continue
        if tm > 8:
            tm = max(tm // 2, 8)
            continue
        break
    # TODO(synk): add a K (d_model) grid axis with an f32 accumulator scratch for very
    # large d_model on v7x, where even one double-buffered (d_model, tn) weight tile is
    # too large for the 64 MiB per-TC VMEM.

    assert vocab % tn == 0, "block_cols must divide vocab"
    padded_rows = _round_up(m_rows, tm)
    if padded_rows != m_rows:
        x2 = jnp.pad(x2, ((0, padded_rows - m_rows), (0, 0)))

    vmem_limit = int(min(budget, max(int(est_bytes(tm, tn) * 1.25), 32 * 1024 * 1024)))
    n_row, n_vocab = padded_rows // tm, vocab // tn

    if n_vocab == 1:
        # Small vocab: whole (d_model, vocab) weight tile fits; no recompute pass needed.
        out = pl.pallas_call(
            _fused_kernel,
            out_shape=jax.ShapeDtypeStruct((padded_rows, vocab), out_dtype),
            grid=(n_row,),
            in_specs=[
                pl.BlockSpec((tm, d_model), lambda i: (i, 0)),     # activation row tile
                pl.BlockSpec((d_model, vocab), lambda i: (0, 0)),  # weight, resident
                pl.BlockSpec((1, vocab), lambda i: (0, 0)),        # bias, resident
            ],
            out_specs=pl.BlockSpec((tm, vocab), lambda i: (i, 0)),
            compiler_params=pltpu.CompilerParams(
                dimension_semantics=("parallel",),
                vmem_limit_bytes=vmem_limit,
            ),
            interpret=interpret,
        )(x2, w, b2)
    else:
        # Vocab-tiled two-pass (online log-sum-exp, then recompute + normalize).
        # TODO(synk): on v5e with large d_model, a write-then-correct second pass (output
        # aliased as input) avoids the 2x MXU recompute at the cost of extra HBM traffic.
        out = pl.pallas_call(
            _tiled_kernel,
            out_shape=jax.ShapeDtypeStruct((padded_rows, vocab), out_dtype),
            grid=(n_row, 2, n_vocab),
            in_specs=[
                pl.BlockSpec((tm, d_model), lambda i, p, k: (i, 0)),
                pl.BlockSpec((d_model, tn), lambda i, p, k: (0, k)),
                pl.BlockSpec((1, tn), lambda i, p, k: (0, k)),
            ],
            # Index held at (i, 0) through phase 0 => no writeback of unwritten blocks.
            out_specs=pl.BlockSpec((tm, tn), lambda i, p, k: (i, p * k)),
            scratch_shapes=[
                pltpu.VMEM((tm, 1), jnp.float32),   # running max
                pltpu.VMEM((tm, 1), jnp.float32),   # running sum-exp
            ],
            compiler_params=pltpu.CompilerParams(
                dimension_semantics=("parallel", "arbitrary", "arbitrary"),
                vmem_limit_bytes=vmem_limit,
            ),
            interpret=interpret,
        )(x2, w, b2)

    if padded_rows != m_rows:
        out = out[:m_rows]
    return out.reshape(*lead, vocab)


# ------------------------------ pure-JAX reference ------------------------------

def reference(x, w, b):
    return jax.nn.log_softmax(x @ w + b, axis=-1)


if __name__ == "__main__":
    B, T, D, V = 2, 8, 32, 128   # batch, seq, d_model, vocab (lane-dense: 128)

    key = jax.random.PRNGKey(0)
    kx, kw, kb = jax.random.split(key, 3)
    x = jax.random.normal(kx, (B, T, D), jnp.float32)
    # nn.Linear(d_model, vocab) stores weight as (vocab, d_model); we pass it pre-transposed
    # to (d_model, vocab) so vocab lands on the TPU lane axis.
    w = jax.random.normal(kw, (D, V), jnp.float32) * 0.1
    b = jax.random.normal(kb, (V,), jnp.float32) * 0.1

    # 1) small-vocab single-pass path
    out = jax.block_until_ready(generator(x, w, b))
    ref = reference(x, w, b)
    assert out.shape == (B, T, V)
    assert jnp.allclose(out, ref, atol=1e-3, rtol=1e-3), (
        f"max abs diff {float(jnp.max(jnp.abs(out - ref)))}")

    # 2) vocab-tiled two-pass path (forced tn=128 -> 4 vocab tiles) + non-divisible row
    #    count (exercises the zero-pad row path) + explicit f32 output dtype.
    T2, V2 = 7, 512
    x2 = jax.random.normal(kx, (B, T2, D), jnp.float32)
    w2 = jax.random.normal(kw, (D, V2), jnp.float32) * 0.1
    b2 = jax.random.normal(kb, (V2,), jnp.float32) * 0.1
    out2 = jax.block_until_ready(
        generator(x2, w2, b2, block_cols=128, out_dtype=jnp.float32))
    ref2 = reference(x2, w2, b2)
    assert out2.shape == (B, T2, V2)
    assert jnp.allclose(out2, ref2, atol=1e-3, rtol=1e-3), (
        f"max abs diff {float(jnp.max(jnp.abs(out2 - ref2)))}")

    # 3) bf16 operands compile/run (MXU-native path); accumulation & softmax stats stay f32.
    out_bf16 = jax.block_until_ready(
        generator(x.astype(jnp.bfloat16), w.astype(jnp.bfloat16), b.astype(jnp.bfloat16)))
    assert out_bf16.shape == (B, T, V)
    assert bool(jnp.all(jnp.isfinite(out_bf16.astype(jnp.float32))))

    print("KERNEL_OK")
</pallas_src>

<mosaic_0001>
module attributes {stable_mosaic.version = 11 : i64} {
  func.func @_fused_kernel(%arg0: i32, %arg1: memref<16x32xf32, #tpu.memory_space<vmem>>, %arg2: memref<32x128xf32, #tpu.memory_space<vmem>>, %arg3: memref<1x128xf32, #tpu.memory_space<vmem>>, %arg4: memref<16x128xf32, #tpu.memory_space<vmem>>) attributes {dimension_semantics = [#tpu.dimension_semantics<parallel>], iteration_bounds = array<i64: 1>, scalar_prefetch = 0 : i64, scratch_operands = 0 : i64, tpu.core_type = #tpu.core_type<tc>, window_params = [{transform_indices = @transform_0, window_bounds = array<i64: 16, 32>}, {pipeline_mode = #tpu.pipeline_mode<synchronous>, transform_indices = @transform_1, window_bounds = array<i64: 32, 128>}, {pipeline_mode = #tpu.pipeline_mode<synchronous>, transform_indices = @transform_2, window_bounds = array<i64: 1, 128>}, {transform_indices = @transform_3, window_bounds = array<i64: 16, 128>}]} {
    %c0 = arith.constant 0 : index
    %c0_0 = arith.constant 0 : index
    %0 = vector.load %arg1[%c0, %c0_0] : memref<16x32xf32, #tpu.memory_space<vmem>>, vector<16x32xf32>
    %c0_1 = arith.constant 0 : index
    %c0_2 = arith.constant 0 : index
    %1 = vector.load %arg2[%c0_1, %c0_2] : memref<32x128xf32, #tpu.memory_space<vmem>>, vector<32x128xf32>
    %cst = arith.constant dense<0.000000e+00> : vector<16x128xf32>
    %2 = tpu.matmul %0, %1, %cst {dimension_numbers = #tpu.dot_dimension_numbers<[1], [0], [0], [1], [0, 0, 1, 1], [], []>} : vector<16x32xf32>, vector<32x128xf32>, vector<16x128xf32> -> vector<16x128xf32>
    %c0_3 = arith.constant 0 : index
    %c0_4 = arith.constant 0 : index
    %3 = vector.load %arg3[%c0_3, %c0_4] : memref<1x128xf32, #tpu.memory_space<vmem>>, vector<1x128xf32>
    %4 = vector.broadcast %3 : vector<1x128xf32> to vector<16x128xf32>
    %5 = arith.addf %2, %4 : vector<16x128xf32>
    %cst_5 = arith.constant dense<0xFF800000> : vector<16xf32>
    %6 = vector.multi_reduction <maximumf>, %5, %cst_5 [1] : vector<16x128xf32> to vector<16xf32>
    %7 = vector.shape_cast %6 : vector<16xf32> to vector<16x1xf32>
    %8 = vector.broadcast %7 : vector<16x1xf32> to vector<16x128xf32>
    %9 = arith.subf %5, %8 : vector<16x128xf32>
    %10 = math.exp %9 : vector<16x128xf32>
    %cst_6 = arith.constant dense<0.000000e+00> : vector<16xf32>
    %11 = vector.multi_reduction <add>, %10, %cst_6 [1] : vector<16x128xf32> to vector<16xf32>
    %12 = vector.shape_cast %11 : vector<16xf32> to vector<16x1xf32>
    %13 = math.log %12 : vector<16x1xf32>
    %14 = vector.broadcast %13 : vector<16x1xf32> to vector<16x128xf32>
    %15 = arith.subf %9, %14 : vector<16x128xf32>
    %c0_7 = arith.constant 0 : index
    %c0_8 = arith.constant 0 : index
    %16 = vector.load %arg4[%c0_7, %c0_8] : memref<16x128xf32, #tpu.memory_space<vmem>>, vector<16x128xf32>
    tpu.vector_store %arg4[%c0_7, %c0_8], %15 {strides = array<i32>} : memref<16x128xf32, #tpu.memory_space<vmem>>, vector<16x128xf32>,
    return
  }
  func.func @transform_0(%arg0: i32) -> (i32, i32) {
    %c0_i32 = arith.constant 0 : i32
    %c0_i32_0 = arith.constant 0 : i32
    return %arg0, %c0_i32 : i32, i32
  }
  func.func @transform_1(%arg0: i32) -> (i32, i32) {
    %c0_i32 = arith.constant 0 : i32
    %c0_i32_0 = arith.constant 0 : i32
    %c0_i32_1 = arith.constant 0 : i32
    return %c0_i32, %c0_i32_0 : i32, i32
  }
  func.func @transform_2(%arg0: i32) -> (i32, i32) {
    %c0_i32 = arith.constant 0 : i32
    %c0_i32_0 = arith.constant 0 : i32
    %c0_i32_1 = arith.constant 0 : i32
    return %c0_i32, %c0_i32_0 : i32, i32
  }
  func.func @transform_3(%arg0: i32) -> (i32, i32) {
    %c0_i32 = arith.constant 0 : i32
    %c0_i32_0 = arith.constant 0 : i32
    return %arg0, %c0_i32 : i32, i32
  }
}

</mosaic_0001>

<bundles_post_ra>
// kernel: tpu_custom_call.1
= control target key start
LH: loop header
LB: loop body
LE: loop exit
PB: predicated region body
PF: predicated region fallthrough
CT: control target
= control target key end

     0   :  { %8 = vsyncpa [#allocation3], 0  ;;  %s364_s0 = inlined_call_operand.hbm [shape: f32[16,32], index: 0, kind: input, shape index: {}]   ;;  %s365_s1 = inlined_call_operand.hbm [shape: f32[32,128], index: 1, kind: input, shape index: {}]   ;;  %s366_s2 = inlined_call_operand.vmem [shape: f32[1,128], index: 2, kind: input, shape index: {}]   ;;  %s367_s3 = inlined_call_operand.hbm [shape: f32[16,128], index: 3, kind: output, shape index: {}]  }
   0x1   :  { %9 = vsyncpa [#allocation6], 0 }
   0x2   :  { %10 = vsyncpa [#allocation4], 0  ;;  %s291_s12 = smov [#allocation2]   ;;  %s219_s16 = scalar_lea.hbm %s364_s0, 256 }
   0x3   :  { %s16_s13 = sshll.u32 %s291_s12, 4  ;;  %p220_p0 = scmp.ne.s32.totalorder %s364_s0, %s219_s16  ;;  %s17_s13 = int_to_ptr.vmem [resolvable:$true] %s16_s13 }
   0x4   :  { %p223_p1 = scmp.lt.u32.totalorder %s219_s16, %s364_s0 }
   0x6   :  { %p225_p2 = pnand %p223_p1, %p220_p0 }
   0x8   :  { %228 = shalt.err (!%p225_p2)
}
   0x9   :  { %s229_s21 = scalar_lea.vmem %s17_s13, 256  ;;  %p234_p4 = scmp.lt.s32.totalorder %s17_s13, %s17_s13 }
   0xa   :  { %p230_p3 = scmp.ne.s32.totalorder %s17_s13, %s229_s21  ;;  %p235_p5 = scmp.lt.s32.totalorder %s229_s21, %s229_s21 }
   0xc   :  { %p236_p6 = por %p235_p5, %p234_p4 }
   0xe   :  { %p237_p7 = pnand %p236_p6, %p230_p3 }
  0x10   :  { %240 = shalt.err (!%p237_p7)
}
  0x11   :  { %s292_s22 = smov 128   ;;  %s293_s23 = smov 8  }
  0x12   :  { %22 = dma.hbm_to_vmem [thread:$0]  %s364_s0, 256, %s17_s13, [#allocation3], %s292_s22, %s292_s22, %s293_s23  }
  0x13   :  { %s294_s26 = smov [#allocation5]   ;;  %s241_s30 = scalar_lea.hbm %s365_s1, 512 }
  0x14   :  { %s28_s27 = sshll.u32 %s294_s26, 4  ;;  %p242_p8 = scmp.ne.s32.totalorder %s365_s1, %s241_s30  ;;  %s29_s27 = int_to_ptr.vmem [resolvable:$true] %s28_s27 }
  0x15   :  { %p245_p9 = scmp.lt.u32.totalorder %s241_s30, %s365_s1 }
  0x17   :  { %p247_p10 = pnand %p245_p9, %p242_p8 }
  0x19   :  { %250 = shalt.err (!%p247_p10)
}
  0x1a   :  { %s251_s8 = scalar_lea.vmem %s29_s27, 512  ;;  %p256_p12 = scmp.lt.s32.totalorder %s29_s27, %s29_s27 }
  0x1b   :  { %p252_p11 = scmp.ne.s32.totalorder %s29_s27, %s251_s8  ;;  %p257_p13 = scmp.lt.s32.totalorder %s251_s8, %s251_s8 }
  0x1d   :  { %p258_p0 = por %p257_p13, %p256_p12 }
  0x1f   :  { %p259_p1 = pnand %p258_p0, %p252_p11 }
  0x21   :  { %262 = shalt.err (!%p259_p1)
}
  0x22   :  { %34 = dma.hbm_to_vmem [thread:$0]  %s365_s1, 512, %s29_s27, [#allocation6], %s292_s22, %s292_s22, %s293_s23  }
  0x23   :  { %285 = dma.done.wait [#allocation3], 256  }
  0x24   :  { %286 = vsyncadd [#allocation3], 4294967040 }
  0x25   :  { %287 = dma.done.wait [#allocation6], 512  }
  0x26   :  { %288 = vsyncadd [#allocation6], 4294966784  ;;  %vm56_vm0 = vcmask 261120   ;;  %v45_v0 = vld [vmem:[#allocation5] sm:$0xff]  ;;  %v46_v1 = vld [vmem:[#allocation5 + $0x8] sm:$0xff] }
  0x27   :  { %v47_v2 = vld [vmem:[#allocation5 + $0x10] sm:$0xff]  ;;  %v198_v3 = vpack.c.bf16 %v46_v1, %v45_v0  ;;  %v48_v4 = vld [vmem:[#allocation5 + $0x18] sm:$0xff] }
  0x28   :  { %v43_v5 = vld [vmem:[#allocation2] sm:$0xff]  ;;  %v202_v6 = vpack.c.bf16 %v48_v4, %v47_v2  ;;  %v44_v7 = vld [vmem:[#allocation2 + $0x8] sm:$0xff] }
  0x29   :  { %195 = vmatprep.mubr.msk.f32.mxu0 %vm56_vm0, %v43_v5  ;;  %199 = vmatprep.subr.bf16.mxu0 %v198_v3  ;;  %v178_v8 = vld [vmem:[%s366_s2] ss:$0 sm:$0xff]  ;;  %s295_s2 = smov [#allocation7]  }
  0x2a   :  { %201 = vmatpush3.bf16.msra.mxu0 %v198_v3  ;;  %s165_s11 = sshll.u32 %s295_s2, 4  ;;  %s166_s11 = int_to_ptr.vmem [resolvable:$true] %s165_s11 }
  0x2b   :  { %203 = vmatprep.subr.bf16.mxu0 %v202_v6  ;;  %s263_s12 = scalar_lea.vmem %s166_s11, 256  ;;  %p268_p3 = scmp.lt.s32.totalorder %s166_s11, %s166_s11 }
  0x2c   :  { %p264_p2 = scmp.ne.s32.totalorder %s166_s11, %s263_s12  ;;  %p269_p4 = scmp.lt.s32.totalorder %s263_s12, %s263_s12 }
  0x2e   :  { %205 = vmatpush3.bf16.msra.mxu0 %v202_v6  ;;  %p270_p5 = por %p269_p4, %p268_p3 }
  0x30   :  { %p271_p6 = pnand %p270_p5, %p264_p2 }
  0x31   :  { %196 = vmatmul.mubr.msk.f32.vlgmr.msra.gmra.mrb[0].mxu0 %vm56_vm0, %v44_v7 }
 0x104   :  { %v197_v9 = vpop.f32.mrb[0].mxu0 }
 0x105   :  { %v129_v10 = vpop.f32.mrb[1].mxu0  ;;  %v135_v12 = vadd.f32 %v197_v9, %v178_v8 }
 0x106   :  { %v130_v11 = vadd.f32 %v178_v8, %v129_v10 }
 0x108   :  { %138 = vmax.xlane.f32.xlu0 %v130_v11 }
 0x10c   :  { %140 = vmax.xlane.f32.xlu0 %v135_v12 }
 0x195   :  { %v139_v13 = vpop.xlane.xlu0 %138 }
 0x196   :  { %v142_v14 = vsub.f32 %v130_v11, %v139_v13 }
 0x198   :  { %v144_v15 = vmul.f32 1.442695, %v142_v14 }
 0x199   :  { %v141_v16 = vpop.xlane.xlu0 %140 }
 0x19a   :  { %v143_v17 = vsub.f32 %v135_v12, %v141_v16  ;;  %211 = vpow2.f32 %v144_v15 }
 0x19c   :  { %v146_v18 = vmul.f32 1.442695, %v143_v17 }
 0x19e   :  { %213 = vpow2.f32 %v146_v18 }
 0x1a4   :  { %v212_v19 = vpop.eup %211 }
 0x1a5   :  { %148 = vadd.xlane.f32.xlu1 %v212_v19 }
 0x1a8   :  { %v214_v20 = vpop.eup %213 }
 0x1a9   :  { %150 = vadd.xlane.f32.xlu1 %v214_v20 }
 0x232   :  { %v149_v21 = vpop.xlane.xlu1 %148 }
 0x233   :  { %215 = vlog2.f32 %v149_v21 }
 0x236   :  { %v151_v22 = vpop.xlane.xlu1 %150 }
 0x237   :  { %217 = vlog2.f32 %v151_v22 }
 0x23d   :  { %v216_v23 = vpop.eup %215 }
 0x23e   :  { %v153_v24 = vmul.f32 0.6931472, %v216_v23 }
 0x240   :  { %v156_v25 = vsub.f32 %v142_v14, %v153_v24 }
 0x241   :  { %v218_v26 = vpop.eup %217 }
 0x242   :  { %158 = vst [vmem:[#allocation7] sm:$0xff] %v156_v25  ;;  %v155_v27 = vmul.f32 0.6931472, %v218_v26 }
 0x244   :  { %v157_v28 = vsub.f32 %v143_v17, %v155_v27 }
 0x246   :  { %159 = vst [vmem:[#allocation7 + $0x8] sm:$0xff] %v157_v28 }
 0x247   :  { %274 = shalt.err (!%p271_p6)
}
 0x248   :  { %s275_s15 = scalar_lea.hbm %s367_s3, 256 }
 0x249   :  { %p276_p7 = scmp.ne.s32.totalorder %s367_s3, %s275_s15  ;;  %p279_p8 = scmp.lt.u32.totalorder %s275_s15, %s367_s3 }
 0x24b   :  { %p281_p9 = pnand %p279_p8, %p276_p7 }
 0x24d   :  { %284 = shalt.err (!%p281_p9)
}
 0x24e   :  { %171 = dma.vmem_to_hbm [thread:$0]  %s166_s11, 256, %s367_s3, [#allocation4], %s292_s22, %s292_s22, %s293_s23  }
 0x24f   :  { %289 = dma.done.wait [#allocation4], 256  }
 0x250   :  { %290 = vsyncadd [#allocation4], 4294967040 }
 0x251   :  { %175 = vsyncpa [#allocation3], 1 }
 0x252   :  { %176 = vsyncpa [#allocation6], 1 }
 0x253   :  { %177 = vsyncpa [#allocation4], 1 }

</bundles_post_ra>
